<compile_context>
chip_gen: v7x
topology: tpu7x:2x2x1
jax: 0.10.0
libtpu: 0.0.40
codegen_flags: <defaults>
</compile_context>

<pallas_src>
import jax
import jax.numpy as jnp
from jax.experimental import pallas as pl
from jax.experimental.pallas import tpu as pltpu


def _rbf_kernel(neg_gamma_ref, x_ref, mu_ref, o_ref):
    # neg_gamma_ref: [1, 1] scalar (-gamma) in SMEM
    # x_ref        : [bn, 1] distance tile (f32)
    # mu_ref       : [1, F]  RBF centers, resident across the grid
    # o_ref        : [bn, F] output in the caller's dtype
    ng = neg_gamma_ref[0, 0]
    d = x_ref[...] - mu_ref[...]                    # [bn, F] broadcast (VPU)
    o_ref[...] = jnp.exp((d * d) * ng).astype(o_ref.dtype)   # exp on EUP


def _round_up(v, m):
    return ((v + m - 1) // m) * m


def rbf(x, mu, gamma, *, bn=2048, vmem_budget_bytes=12 * 1024 * 1024):
    """out[..., f] = exp(-(x[..., 0] - mu[f])**2 * gamma)."""
    orig_shape = x.shape
    assert orig_shape[-1] == 1, "RBF expects x with a trailing singleton dim"
    out_dtype = x.dtype
    F = mu.shape[0]

    x2 = x.reshape(-1, 1).astype(jnp.float32)
    N = x2.shape[0]

    # --- tile sizing with correct (lane-padded, double-buffered) VMEM math:
    #   out tile per buffer : bn * roundup(F, 128) * itemsize(out)
    #   x   tile per buffer : bn * 128 * 4   ((bn, 1) f32 pads to 128 lanes)
    # each double-buffered by the BlockSpec pipeline.
    f_lanes = _round_up(F, 128)
    out_itemsize = jnp.dtype(out_dtype).itemsize
    bytes_per_row = 2 * (f_lanes * out_itemsize + 128 * 4)
    max_bn_vmem = max(8, vmem_budget_bytes // bytes_per_row)

    n_rounded = max(8, _round_up(N, 8))
    bn_eff = min(bn, max_bn_vmem, n_rounded)
    if N > 8:
        # keep at least 2 grid steps so v7x's second TensorCore has work
        half = max(8, _round_up(-(-N // 2), 8))
        bn_eff = min(bn_eff, half)
    bn_eff = max(8, (bn_eff // 8) * 8)              # sublane aligned

    mu2 = mu.reshape(1, F).astype(jnp.float32)
    neg_gamma = (-jnp.asarray(gamma, dtype=jnp.float32)).reshape(1, 1)

    grid = (pl.cdiv(N, bn_eff),)                    # ragged last block is OK:
    out = pl.pallas_call(                           # OOB output rows are masked
        _rbf_kernel,
        out_shape=jax.ShapeDtypeStruct((N, F), out_dtype),
        grid_spec=pltpu.PrefetchScalarGridSpec(
            num_scalar_prefetch=0,
            grid=grid,
            in_specs=[
                pl.BlockSpec(memory_space=pltpu.MemorySpace.SMEM),  # -gamma
                pl.BlockSpec((bn_eff, 1), lambda n: (n, 0)),        # x tile
                pl.BlockSpec((1, F), lambda n: (0, 0)),             # mu (resident)
            ],
            out_specs=pl.BlockSpec((bn_eff, F), lambda n: (n, 0)),
        ),
        compiler_params=pltpu.CompilerParams(
            dimension_semantics=("parallel",)),
    )(neg_gamma, x2, mu2)

    return out.reshape(orig_shape[:-1] + (F,))


if __name__ == "__main__":
    key = jax.random.PRNGKey(0)

    # Module defaults: mu = linspace(0, 30, 300), gamma = 10.0
    F = 300
    mu = jnp.linspace(0.0, 30.0, F, dtype=jnp.float32)
    gamma = 10.0

    # Small input consistent with the module: distances with trailing dim 1.
    x = jax.random.uniform(key, (8, 8, 1), dtype=jnp.float32,
                           minval=0.0, maxval=30.0)

    out = rbf(x, mu, gamma)
    out = jax.block_until_ready(out)
    ref = jnp.exp(-jnp.square(x - mu) * gamma)
    assert out.shape == (8, 8, F)
    assert out.dtype == x.dtype
    assert jnp.allclose(out, ref, atol=1e-5, rtol=1e-5)

    # Ragged-N path (N not a multiple of the row tile) — exercises the
    # cdiv grid / masked final block with no wrapper pad or slice copy.
    key2 = jax.random.PRNGKey(1)
    x2 = jax.random.uniform(key2, (5, 7, 1), dtype=jnp.float32,
                            minval=0.0, maxval=30.0)
    out2 = jax.block_until_ready(rbf(x2, mu, gamma))
    ref2 = jnp.exp(-jnp.square(x2 - mu) * gamma)
    assert out2.shape == (5, 7, F)
    assert jnp.allclose(out2, ref2, atol=1e-5, rtol=1e-5)

    print("KERNEL_OK")
</pallas_src>

<mosaic_0001>
module attributes {stable_mosaic.version = 11 : i64} {
  func.func @_rbf_kernel(%arg0: i32, %arg1: memref<1x1xf32, #tpu.memory_space<smem>>, %arg2: memref<32x1xf32, #tpu.memory_space<vmem>>, %arg3: memref<1x300xf32, #tpu.memory_space<vmem>>, %arg4: memref<32x300xf32, #tpu.memory_space<vmem>>) attributes {dimension_semantics = [#tpu.dimension_semantics<parallel>], iteration_bounds = array<i64: 2>, scalar_prefetch = 0 : i64, scratch_operands = 0 : i64, tpu.core_type = #tpu.core_type<tc>, window_params = [{transform_indices = @transform_0, window_bounds = array<i64: 1, 1>}, {transform_indices = @transform_1, window_bounds = array<i64: 32, 1>}, {pipeline_mode = #tpu.pipeline_mode<synchronous>, transform_indices = @transform_2, window_bounds = array<i64: 1, 300>}, {transform_indices = @transform_3, window_bounds = array<i64: 32, 300>}]} {
    %c0 = arith.constant 0 : index
    %c0_0 = arith.constant 0 : index
    %0 = memref.load %arg1[%c0, %c0_0] : memref<1x1xf32, #tpu.memory_space<smem>>
    %c0_1 = arith.constant 0 : index
    %c0_2 = arith.constant 0 : index
    %1 = vector.load %arg2[%c0_1, %c0_2] : memref<32x1xf32, #tpu.memory_space<vmem>>, vector<32x1xf32>
    %c0_3 = arith.constant 0 : index
    %c0_4 = arith.constant 0 : index
    %2 = vector.load %arg3[%c0_3, %c0_4] : memref<1x300xf32, #tpu.memory_space<vmem>>, vector<1x300xf32>
    %3 = vector.broadcast %1 : vector<32x1xf32> to vector<32x300xf32>
    %4 = vector.broadcast %2 : vector<1x300xf32> to vector<32x300xf32>
    %5 = arith.subf %3, %4 : vector<32x300xf32>
    %6 = arith.mulf %5, %5 : vector<32x300xf32>
    %7 = vector.broadcast %0 : f32 to vector<32x300xf32>
    %8 = arith.mulf %6, %7 : vector<32x300xf32>
    %9 = math.exp %8 : vector<32x300xf32>
    %c0_5 = arith.constant 0 : index
    %c0_6 = arith.constant 0 : index
    %10 = vector.load %arg4[%c0_5, %c0_6] : memref<32x300xf32, #tpu.memory_space<vmem>>, vector<32x300xf32>
    tpu.vector_store %arg4[%c0_5, %c0_6], %9 {strides = array<i32>} : memref<32x300xf32, #tpu.memory_space<vmem>>, vector<32x300xf32>,
    return
  }
  func.func @transform_0(%arg0: i32) -> (i32, i32) {
    %c0_i32 = arith.constant 0 : i32
    %c0_i32_0 = arith.constant 0 : i32
    %c0_i32_1 = arith.constant 0 : i32
    return %c0_i32, %c0_i32_0 : i32, i32
  }
  func.func @transform_1(%arg0: i32) -> (i32, i32) {
    %c0_i32 = arith.constant 0 : i32
    %c0_i32_0 = arith.constant 0 : i32
    return %arg0, %c0_i32 : i32, i32
  }
  func.func @transform_2(%arg0: i32) -> (i32, i32) {
    %c0_i32 = arith.constant 0 : i32
    %c0_i32_0 = arith.constant 0 : i32
    %c0_i32_1 = arith.constant 0 : i32
    return %c0_i32, %c0_i32_0 : i32, i32
  }
  func.func @transform_3(%arg0: i32) -> (i32, i32) {
    %c0_i32 = arith.constant 0 : i32
    %c0_i32_0 = arith.constant 0 : i32
    return %arg0, %c0_i32 : i32, i32
  }
}

</mosaic_0001>

<bundles_post_ra>
// kernel: tpu_custom_call.1
= control target key start
LH: loop header
LB: loop body
LE: loop exit
PB: predicated region body
PF: predicated region fallthrough
CT: control target
= control target key end

     0   :  { %s651_s0 = inlined_call_operand.<no memory space> [shape: f32[1,1], index: 0, kind: input, shape index: {}]   ;;  %s652_s1 = inlined_call_operand.vmem [shape: f32[64,1], index: 1, kind: input, shape index: {}]   ;;  %s653_s2 = inlined_call_operand.vmem [shape: f32[1,300], index: 2, kind: input, shape index: {}]   ;;  %s654_s3 = inlined_call_operand.hbm [shape: f32[64,300], index: 3, kind: output, shape index: {}]  }
   0x1   :  { %8 = sst [smem:[#allocation2]] %s651_s0 }
   0x2   :  { %9 = vsyncpa [#allocation4], 0 }
   0x3   :  { %11 = vsyncpa [#allocation4 + $0x1], 0  ;;  %s538_s14 = smov 0   ;;  %s540_s15 = smov 0  }
   0x4   :  { %s542_s16 = smov 0   ;;  %s544_s17 = smov 0  }
   0x5 LB: > { %s559_s0 = sadd.s32 4294967295, %s509_s17   ;;  %s366_s18 = sadd.s32 4294967294, %s509_s17   ;;  %s509_s17 = sphi %s544_s17, %s660_s17   ;;  %s505_s16 = sphi %s542_s16, %s659_s16   ;;  %s501_s15 = sphi %s540_s15, %s658_s15   ;;  %s497_s14 = sphi %s538_s14, %s657_s14  }
   0x6   : > { %s563_s19 = sadd.s32 1, %s509_s17   ;;  %s92_s20 = sadd.s32 1, %s505_s16 }
   0x7   : > { %s89_s21 = ssub.s32 %s509_s17, %s563_s19  ;;  %p102_p0 = scmp.ne.s32.totalorder %s505_s16, %s501_s15 }
   0x8   : > { %p90_p1 = scmp.eq.s32.totalorder %s89_s21, 0  ;;  %p103_p2 = scmp.eq.s32.totalorder %s559_s0, 1 }
   0x9   : > { %p108_p3 = scmp.ne.s32.totalorder %s501_s15, %s497_s14  ;;  %p109_p4 = scmp.eq.s32.totalorder %s366_s18, 1 }
   0xa   : > { %s574_s22 = scalar_select %p90_p1, %s505_s16, %s92_s20  }
   0xb   : > { %p576_p5 = por %p103_p2, %p102_p0  ;;  %p580_p6 = por %p109_p4, %p108_p3 }
   0xc   : > { %p369_p7 = scmp.ge.s32.totalorder %s509_s17, 1  ;;  %p142_p8 = scmp.lt.s32.totalorder %s509_s17, 3 }
   0xe   : > { %p143_p9 = pnand %p369_p7, %p142_p8 }
   0xf   : > { %s370_s25 = sshll.u32 (!%p143_p9), %s559_s0, 2  ;;  %v511_v0 = vmov (!%p143_p9), 0   ;;  %v200_v5 = vlaneseq (!%p143_p9)  ;;  %s173_s30 = sld [smem:[#allocation2]] (!%p143_p9)  ;;  %v178_v10 = vld [vmem:[%s653_s2] sm:$0x7] (!%p143_p9)  ;;  %vm278_vm0 = vcmask (!%p143_p9), 359424  }
  0x10   : > { %146 = sbr.rel (%p143_p9) target bundleno = 200 (0xc8), region = 32  ;;  %422 = vset.pattern.permute.xlu1 (!%p143_p9), %v511_v0  ;;  %421 = vset.pattern.permute.xlu0 (!%p143_p9), %v511_v0  ;;  %p167_p10 = scmp.lt.s32.totalorder (!%p143_p9), %s370_s25, 7 }
  0x11   : > { %v201_v6 = vshrl.u32 (!%p143_p9), %v200_v5, 7  ;;  %s163_s6 = sand.u32 (!%p143_p9), 1, %s501_s15   ;;  %s378_s9 = smul.u32 (!%p143_p9), 1536, %s559_s0 }
  0x12   : > { %s377_s7 = smul.u32 (!%p143_p9), 96, %s163_s6  ;;  %s610_s0 = scalar_lea.sflag (!%p143_p9), [#allocation4], %s163_s6 }
  0x13   : > { %v202_v7 = vsub.s32 (!%p143_p9), 0, %v201_v6  ;;  %v206_v8 = vsub.s32 (!%p143_p9), 1, %v201_v6  ;;  %v210_v9 = vsub.s32 (!%p143_p9), 2, %v201_v6  ;;  %s603_s13 = scalar_lea.hbm (!%p143_p9), %s654_s3, %s378_s9  ;;  %s512_s20 = smov (!%p143_p9), [#allocation3]  }
  0x14   : > { %s165_s8 = scalar_lea.vmem (!%p143_p9), [#allocation3], %s377_s7  ;;  %s451_s21 = sshll.u32 (!%p143_p9), %s512_s20, 4  ;;  %s452_s21 = int_to_ptr.vmem [resolvable:$false] %s451_s21 }
  0x15   : > { %v203_v11 = vrot.slane (!%p143_p9), %v178_v10, %v202_v7  ;;  %v207_v12 = vrot.slane (!%p143_p9), %v178_v10, %v206_v8  ;;  %v211_v13 = vrot.slane (!%p143_p9), %v178_v10, %v210_v9  ;;  %v239_v20 = vstv (!%p143_p9), %s173_s30  ;;  %s304_s10 = sshll.u32 (!%p143_p9), %s165_s8, 4  ;;  %s605_s10 = int_to_ptr.vmem [resolvable:$true] %s304_s10 }
  0x16   : > { %s447_s18 = scalar_lea.vmem (!%p143_p9), %s605_s10, 1536  ;;  %p454_p0 = scmp.lt.s32.totalorder (!%p143_p9), %s605_s10, %s452_s21 }
  0x17   : > { %s662_s25 = smov (!%p167_p10, %s370_s25), 7  ;;  %p448_p11 = scmp.ne.s32.totalorder %s605_s10, %s447_s18 }
  0x18   : > { %s371_s26 = sshll.u32 %s662_s25, 3  ;;  %s453_s25 = scalar_lea.vmem %s452_s21, 3072 }
  0x19   : > { %s170_s29 = scalar_lea.vmem %s652_s1, %s371_s26  ;;  %p449_p12 = pnand %p448_p11, %p576_p5 }
  0x1a   : > { %v176_v1 = vld [vmem:[%s170_s29 + $0x10] sm:$0xff]  ;;  %v174_v2 = vld [vmem:[%s170_s29] sm:$0xff]  ;;  %v177_v3 = vld [vmem:[%s170_s29 + $0x18] sm:$0xff]  ;;  %p455_p1 = scmp.lt.s32.totalorder %s453_s25, %s447_s18 }
  0x1b   : > { %191 = vperm.xlu1 %422, %v176_v1   ;;  %181 = vperm.xlu0 %421, %v174_v2   ;;  %v175_v4 = vld [vmem:[%s170_s29 + $0x8] sm:$0xff]  ;;  %p450_p13 = pneg %p449_p12 }
  0x1c   : > { %p456_p2 = por %p455_p1, %p454_p0 }
  0x1e   : > { %p457_p3 = pnand %p456_p2, %p450_p13 }
  0x1f   : > { %196 = vperm.xlu1 %422, %v177_v3   ;;  %186 = vperm.xlu0 %421, %v175_v4  }
  0x9a   : > { %v192_v14 = vpop.permute.xlu1 %191  ;;  %v182_v15 = vpop.permute.xlu0 %181 }
  0x9b   : > { %v221_v16 = vsub.f32 %v192_v14, %v203_v11  ;;  %v222_v17 = vsub.f32 %v192_v14, %v207_v12  ;;  %v223_v18 = vsub.f32 %v192_v14, %v211_v13  ;;  %v215_v19 = vsub.f32 %v182_v15, %v203_v11 }
  0x9c   : > { %v216_v21 = vsub.f32 %v182_v15, %v207_v12  ;;  %v217_v22 = vsub.f32 %v182_v15, %v211_v13 }
  0x9d   : > { %v233_v23 = vmul.f32 %v221_v16, %v221_v16  ;;  %v234_v24 = vmul.f32 %v222_v17, %v222_v17  ;;  %v235_v25 = vmul.f32 %v223_v18, %v223_v18  ;;  %v227_v26 = vmul.f32 %v215_v19, %v215_v19 }
  0x9e   : > { %v228_v27 = vmul.f32 %v216_v21, %v216_v21  ;;  %v229_v28 = vmul.f32 %v217_v22, %v217_v22  ;;  %v197_v29 = vpop.permute.xlu1 %196  ;;  %v187_v38 = vpop.permute.xlu0 %186 }
  0x9f   : > { %v246_v30 = vmul.f32 %v239_v20, %v233_v23  ;;  %v247_v31 = vmul.f32 %v239_v20, %v234_v24  ;;  %v248_v32 = vmul.f32 %v239_v20, %v235_v25  ;;  %v240_v33 = vmul.f32 %v239_v20, %v227_v26 }
  0xa0   : > { %v241_v34 = vmul.f32 %v239_v20, %v228_v27  ;;  %v242_v35 = vmul.f32 %v239_v20, %v229_v28  ;;  %v224_v36 = vsub.f32 %v197_v29, %v203_v11  ;;  %v225_v37 = vsub.f32 %v197_v29, %v207_v12 }
  0xa1   : > { %v264_v39 = vmul.f32 1.442695, %v246_v30  ;;  %v266_v40 = vmul.f32 1.442695, %v247_v31  ;;  %v268_v41 = vmul.f32 1.442695, %v248_v32  ;;  %v226_v42 = vsub.f32 %v197_v29, %v211_v13 }
  0xa2   : > { %v252_v43 = vmul.f32 1.442695, %v240_v33  ;;  %v254_v44 = vmul.f32 1.442695, %v241_v34  ;;  %v256_v45 = vmul.f32 1.442695, %v242_v35  ;;  %v236_v46 = vmul.f32 %v224_v36, %v224_v36 }
  0xa3   : > { %423 = vpow2.f32 %v264_v39  ;;  %v237_v47 = vmul.f32 %v225_v37, %v225_v37  ;;  %v238_v48 = vmul.f32 %v226_v42, %v226_v42  ;;  %v218_v49 = vsub.f32 %v187_v38, %v203_v11 }
  0xa4   : > { %425 = vpow2.f32 %v266_v40  ;;  %v249_v50 = vmul.f32 %v239_v20, %v236_v46  ;;  %v219_v51 = vsub.f32 %v187_v38, %v207_v12  ;;  %v220_v52 = vsub.f32 %v187_v38, %v211_v13 }
  0xa5   : > { %427 = vpow2.f32 %v268_v41  ;;  %v250_v53 = vmul.f32 %v239_v20, %v237_v47  ;;  %v251_v54 = vmul.f32 %v239_v20, %v238_v48  ;;  %v230_v55 = vmul.f32 %v218_v49, %v218_v49 }
  0xa6   : > { %429 = vpow2.f32 %v252_v43  ;;  %v270_v56 = vmul.f32 1.442695, %v249_v50  ;;  %v231_v57 = vmul.f32 %v219_v51, %v219_v51  ;;  %v232_v58 = vmul.f32 %v220_v52, %v220_v52 }
  0xa7   : > { %431 = vpow2.f32 %v254_v44  ;;  %v272_v59 = vmul.f32 1.442695, %v250_v53  ;;  %v274_v60 = vmul.f32 1.442695, %v251_v54  ;;  %v243_v61 = vmul.f32 %v239_v20, %v230_v55 }
  0xa8   : > { %433 = vpow2.f32 %v256_v45  ;;  %v244_v62 = vmul.f32 %v239_v20, %v231_v57  ;;  %v245_v63 = vmul.f32 %v239_v20, %v232_v58 }
  0xa9   : > { %435 = vpow2.f32 %v270_v56  ;;  %v258_v0 = vmul.f32 1.442695, %v243_v61 }
  0xaa   : > { %437 = vpow2.f32 %v272_v59  ;;  %v260_v1 = vmul.f32 1.442695, %v244_v62  ;;  %v262_v2 = vmul.f32 1.442695, %v245_v63 }
  0xab   : > { %439 = vpow2.f32 %v274_v60 }
  0xac   : > { %441 = vpow2.f32 %v258_v0 }
  0xad   : > { %v424_v3 = vpop.eup %423  ;;  %443 = vpow2.f32 %v260_v1 }
  0xae   : > { %v426_v4 = vpop.eup %425  ;;  %283 = vst [vmem:[%s165_s8 + $0x30] sm:$0xff] %v424_v3  ;;  %445 = vpow2.f32 %v262_v2 }
  0xaf   : > { %v428_v5 = vpop.eup %427  ;;  %284 = vst [vmem:[%s165_s8 + $0x38] sm:$0xff] %v426_v4 }
  0xb0   : > { %v430_v6 = vpop.eup %429  ;;  %285 = vst.msk [vmem:[%s165_s8 + $0x40] sm:$0xff] %vm278_vm0, %v428_v5 }
  0xb1   : > { %v432_v7 = vpop.eup %431  ;;  %276 = vst [vmem:[%s165_s8] sm:$0xff] %v430_v6 }
  0xb2   : > { %v434_v8 = vpop.eup %433  ;;  %277 = vst [vmem:[%s165_s8 + $0x8] sm:$0xff] %v432_v7 }
  0xb3   : > { %v436_v9 = vpop.eup %435  ;;  %279 = vst.msk [vmem:[%s165_s8 + $0x10] sm:$0xff] %vm278_vm0, %v434_v8 }
  0xb4   : > { %v438_v10 = vpop.eup %437  ;;  %286 = vst [vmem:[%s165_s8 + $0x48] sm:$0xff] %v436_v9 }
  0xb5   : > { %v440_v11 = vpop.eup %439  ;;  %287 = vst [vmem:[%s165_s8 + $0x50] sm:$0xff] %v438_v10 }
  0xb6   : > { %v442_v12 = vpop.eup %441  ;;  %288 = vst.msk [vmem:[%s165_s8 + $0x58] sm:$0xff] %vm278_vm0, %v440_v11 }
  0xb7   : > { %v444_v13 = vpop.eup %443  ;;  %280 = vst [vmem:[%s165_s8 + $0x18] sm:$0xff] %v442_v12 }
  0xb8   : > { %v446_v14 = vpop.eup %445  ;;  %281 = vst [vmem:[%s165_s8 + $0x20] sm:$0xff] %v444_v13 }
  0xb9   : > { %282 = vst.msk [vmem:[%s165_s8 + $0x28] sm:$0xff] %vm278_vm0, %v446_v14 }
  0xba   : > { %460 = shalt.err (!%p457_p3)
}
  0xbb   : > { %s461_s26 = scalar_lea.hbm %s603_s13, 1536  ;;  %s465_s29 = scalar_lea.hbm %s654_s3, 3072 }
  0xbc   : > { %p462_p4 = scmp.ne.s32.totalorder %s603_s13, %s461_s26  ;;  %p466_p9 = scmp.lt.u32.totalorder %s603_s13, %s654_s3 }
  0xbd   : > { %p467_p10 = scmp.lt.u32.totalorder %s465_s29, %s461_s26  ;;  %p469_p12 = scmp.lt.u32.totalorder %s461_s26, %s603_s13 }
  0xbe   : > { %p463_p7 = pnand %p462_p4, %p576_p5 }
  0xbf   : > { %p468_p11 = por %p467_p10, %p466_p9 }
  0xc0   : > { %p464_p8 = pneg %p463_p7 }
  0xc1   : > { %p470_p13 = por %p469_p12, %p468_p11 }
  0xc3   : > { %p471_p0 = pnand %p470_p13, %p464_p8 }
  0xc5   : > { %474 = shalt.err (!%p471_p0)
}
  0xc6   : > { %s513_s5 = smov 384   ;;  %s514_s6 = smov 24  }
  0xc7   : > { %379 = dma.vmem_to_hbm [thread:$0]  (%p576_p5), %s605_s10, 1536, %s603_s13, %s610_s0, %s513_s5, %s513_s5, %s514_s6  }
  0xc8 PF: > { %p385_p1 = scmp.ge.s32.totalorder %s509_s17, 2  ;;  %s319_s7 = sand.u32 1, %s497_s14  }
  0xc9   : > { %s320_s8 = scalar_lea.sflag [#allocation4], %s319_s7 }
  0xca   : > { %p382_p2 = pnand %p385_p1, %p580_p6 }
  0xcc   : > { %492 = dma.done.wait (!%p382_p2), %s320_s8, 1536  }
  0xcd   : > { %494 = vsyncadd (!%p382_p2), %s320_s8, 4294965760  ;;  %p14_p3 = scmp.ge.s32.totalorder %s563_s19, 4   ;;  %s657_s14 = smov %s501_s15 }
  0xce   : > { %s658_s15 = smov %s505_s16  ;;  %s659_s16 = smov %s574_s22 }
  0xcf   : > { %s660_s17 = smov %s563_s19  ;;  %16 = sbr.rel (!%p14_p3) target bundleno = 5 (0x5), region = 67 }
  0xd6   :  { %325 = vsyncpa [#allocation4], 1 }
  0xd7   :  { %327 = vsyncpa [#allocation4 + $0x1], 1 }

</bundles_post_ra>
